<compile_context>
chip_gen: v7x
topology: tpu7x:2x2x1
jax: 0.10.0
libtpu: 0.0.40
codegen_flags: <defaults>
</compile_context>

<pallas_src>
import jax
import jax.numpy as jnp
from jax.experimental import pallas as pl
from jax.experimental.pallas import tpu as pltpu

EPS = 1e-5
_LANE = 128


def _round_up(n, m):
    return ((n + m - 1) // m) * m


def _vmem_budget_bytes():
    cap = 64 * 1024 * 1024  # conservative fallback (v7x per-TensorCore VMEM)
    try:
        info = pltpu.get_tpu_info()
        cap = int(getattr(info, "vmem_capacity_bytes", cap))
    except Exception:
        pass
    # ~96 MiB on v5e/v6e (128 MiB physical), ~48 MiB per core on v7x (64 MiB).
    return (3 * cap) // 4


def _compiler_params(dim_sem, vmem_limit):
    return pltpu.CompilerParams(
        dimension_semantics=dim_sem,
        vmem_limit_bytes=int(vmem_limit),
    )


# --------------------------------------------------------------------------
# Kernels
# --------------------------------------------------------------------------
def _fused_kernel(x_ref, w1_ref, gamma_ref, beta_ref, w2_ref, o_ref, h_ref):
    # Stage 1: Linear1 (bf16 x bf16 -> f32) + BN1 (f32) + ReLU -> bf16 scratch.
    h = jnp.dot(x_ref[...], w1_ref[...], preferred_element_type=jnp.float32)
    m1 = jnp.mean(h, axis=0, keepdims=True)
    c1 = h - m1
    v1 = jnp.mean(c1 * c1, axis=0, keepdims=True)
    hn = c1 * jax.lax.rsqrt(v1 + EPS) * gamma_ref[...] + beta_ref[...]
    h_ref[...] = jnp.maximum(hn, 0.0).astype(h_ref.dtype)

    # Stage 2: Linear2 + BN2 (no affine) -> f32 output.
    y = jnp.dot(h_ref[...], w2_ref[...], preferred_element_type=jnp.float32)
    m2 = jnp.mean(y, axis=0, keepdims=True)
    c2 = y - m2
    v2 = jnp.mean(c2 * c2, axis=0, keepdims=True)
    o_ref[...] = (c2 * jax.lax.rsqrt(v2 + EPS)).astype(o_ref.dtype)


def _stage1_kernel(x_ref, w1_ref, gamma_ref, beta_ref, h_ref):
    # Collapsed-K: one [B,K]x[K,tn] dot per feature tile; the full batch is
    # resident per tile so BatchNorm batch statistics remain exact.
    a = jnp.dot(x_ref[...], w1_ref[...], preferred_element_type=jnp.float32)
    m = jnp.mean(a, axis=0, keepdims=True)
    c = a - m
    v = jnp.mean(c * c, axis=0, keepdims=True)
    hn = c * jax.lax.rsqrt(v + EPS) * gamma_ref[...] + beta_ref[...]
    h_ref[...] = jnp.maximum(hn, 0.0).astype(h_ref.dtype)


def _stage2_kernel(h_ref, w2_ref, o_ref):
    a = jnp.dot(h_ref[...], w2_ref[...], preferred_element_type=jnp.float32)
    m = jnp.mean(a, axis=0, keepdims=True)
    c = a - m
    v = jnp.mean(c * c, axis=0, keepdims=True)
    o_ref[...] = (c * jax.lax.rsqrt(v + EPS)).astype(o_ref.dtype)


# --------------------------------------------------------------------------
# Launchers
# --------------------------------------------------------------------------
def _weight_spec(k_p, tn, nbuf, index_map):
    if nbuf > 2:
        # Deeper buffering on the only operand whose block changes every step.
        return pl.BlockSpec((k_p, tn), index_map, pipeline_mode=pl.Buffered(nbuf))
    return pl.BlockSpec((k_p, tn), index_map)


def _linear_bn_relu(x, w1, gamma, beta, tn, nbuf, vmem_limit):
    B, K = x.shape
    N = w1.shape[1]
    return pl.pallas_call(
        _stage1_kernel,
        out_shape=jax.ShapeDtypeStruct((B, N), jnp.bfloat16),
        grid_spec=pltpu.PrefetchScalarGridSpec(
            num_scalar_prefetch=0,
            grid=(N // tn,),
            in_specs=[
                pl.BlockSpec((B, K), lambda j: (0, 0)),   # resident: DMA'd once
                _weight_spec(K, tn, nbuf, lambda j: (0, j)),
                pl.BlockSpec((1, tn), lambda j: (0, j)),
                pl.BlockSpec((1, tn), lambda j: (0, j)),
            ],
            out_specs=pl.BlockSpec((B, tn), lambda j: (0, j)),
        ),
        compiler_params=_compiler_params(("parallel",), vmem_limit),
    )(x, w1, gamma, beta)


def _linear_bn(h, w2, tn, nbuf, vmem_limit):
    B, K = h.shape
    N = w2.shape[1]
    return pl.pallas_call(
        _stage2_kernel,
        out_shape=jax.ShapeDtypeStruct((B, N), jnp.float32),
        grid_spec=pltpu.PrefetchScalarGridSpec(
            num_scalar_prefetch=0,
            grid=(N // tn,),
            in_specs=[
                pl.BlockSpec((B, K), lambda j: (0, 0)),   # resident hidden act
                _weight_spec(K, tn, nbuf, lambda j: (0, j)),
            ],
            out_specs=pl.BlockSpec((B, tn), lambda j: (0, j)),
        ),
        compiler_params=_compiler_params(("parallel",), vmem_limit),
    )(h, w2)


def _fused(x, w1, gamma, beta, w2, vmem_limit):
    B, in_p = x.shape
    hid_p = w1.shape[1]
    out_p = w2.shape[1]
    return pl.pallas_call(
        _fused_kernel,
        out_shape=jax.ShapeDtypeStruct((B, out_p), jnp.float32),
        grid_spec=pltpu.PrefetchScalarGridSpec(
            num_scalar_prefetch=0,
            grid=(1,),
            in_specs=[
                pl.BlockSpec((B, in_p), lambda i: (0, 0)),
                pl.BlockSpec((in_p, hid_p), lambda i: (0, 0)),
                pl.BlockSpec((1, hid_p), lambda i: (0, 0)),
                pl.BlockSpec((1, hid_p), lambda i: (0, 0)),
                pl.BlockSpec((hid_p, out_p), lambda i: (0, 0)),
            ],
            out_specs=pl.BlockSpec((B, out_p), lambda i: (0, 0)),
            scratch_shapes=[pltpu.VMEM((B, hid_p), jnp.bfloat16)],
        ),
        compiler_params=_compiler_params(("arbitrary",), vmem_limit),
    )(x, w1, gamma, beta, w2)


# --------------------------------------------------------------------------
# Planning (generation-aware VMEM budgeting / tile selection)
# --------------------------------------------------------------------------
def _stage_vmem_bytes(B, k_p, tn, nbuf_w, out_elem_bytes):
    x_bytes = 2 * B * k_p * 2            # resident batch operand (bf16), 2 bufs worst case
    w_bytes = nbuf_w * k_p * tn * 2      # bf16 weight stream
    o_bytes = 2 * B * tn * out_elem_bytes
    bn_bytes = 4 * tn * 4                # gamma/beta blocks (tiny)
    f32_tmp = B * tn * 4                 # in-kernel f32 matmul result
    return x_bytes + w_bytes + o_bytes + bn_bytes + f32_tmp


def _fused_vmem_bytes(B, in_p, hid_p, out_p):
    x = 2 * B * in_p * 2
    w1 = 2 * in_p * hid_p * 2
    w2 = 2 * hid_p * out_p * 2
    gb = 4 * hid_p * 4
    h_scr = B * hid_p * 2
    y = 2 * B * out_p * 4
    tmp = B * hid_p * 4 + B * out_p * 4  # in-kernel f32 temporaries
    return x + w1 + w2 + gb + h_scr + y + tmp


def _pick_feature_tile(n_pad, B, k_p, out_elem_bytes, budget):
    cands = [t for t in range(_LANE, n_pad + 1, _LANE) if n_pad % t == 0]
    if n_pad >= 2 * _LANE:
        multi = [t for t in cands if n_pad // t >= 2]
        if multi:
            cands = multi  # keep >= 2 feature tiles -> both v7x TensorCores busy
    for t in sorted(cands, reverse=True):
        n_tiles = n_pad // t
        bufs = (3, 2) if n_tiles >= 3 else (2,)
        for nbuf in bufs:
            if _stage_vmem_bytes(B, k_p, t, nbuf, out_elem_bytes) <= budget:
                return t, nbuf
    # TODO(synk): very large B needs a batch-tiled sufficient-statistics BN.
    return _LANE, 2


# --------------------------------------------------------------------------
# Public API
# --------------------------------------------------------------------------
def prepare_projection_params(w1, gamma, beta, w2):
    """One-time weight prep (bf16 cast + lane-dense padding), hoisted out of the
    per-call path so weights are not re-read/re-written in HBM every forward."""
    in_dim, hidden_dim = w1.shape
    out_dim = w2.shape[1]
    in_p = _round_up(in_dim, _LANE)
    hid_p = _round_up(hidden_dim, _LANE)
    out_p = _round_up(out_dim, _LANE)
    w1p = jnp.pad(w1.astype(jnp.bfloat16),
                  ((0, in_p - in_dim), (0, hid_p - hidden_dim)))
    w2p = jnp.pad(w2.astype(jnp.bfloat16),
                  ((0, hid_p - hidden_dim), (0, out_p - out_dim)))
    gp = jnp.pad(gamma.reshape(1, -1).astype(jnp.float32),
                 ((0, 0), (0, hid_p - hidden_dim)), constant_values=1.0)
    bp = jnp.pad(beta.reshape(1, -1).astype(jnp.float32),
                 ((0, 0), (0, hid_p - hidden_dim)))
    return {"w1": w1p, "gamma": gp, "beta": bp, "w2": w2p,
            "dims": (in_dim, hidden_dim, out_dim)}


def projection_mlp_forward(x, params, *, force_tiled=False):
    """x: [B, in_dim] f32/bf16. Returns [B, out_dim] f32 (training-mode BN)."""
    in_dim, hidden_dim, out_dim = params["dims"]
    w1p, gp, bp, w2p = params["w1"], params["gamma"], params["beta"], params["w2"]
    in_p, hid_p = w1p.shape
    out_p = w2p.shape[1]
    B = x.shape[0]

    # Per-call activation prep only (zero pads are inert: padded weight
    # rows/cols are zero; padded BN columns normalize to exactly 0).
    xp = jnp.pad(x.astype(jnp.bfloat16), ((0, 0), (0, in_p - in_dim)))

    budget = _vmem_budget_bytes()

    if not force_tiled and _fused_vmem_bytes(B, in_p, hid_p, out_p) <= budget // 2:
        # Small problems: single fused call, hidden activation never touches HBM.
        y = _fused(xp, w1p, gp, bp, w2p, budget)
    else:
        tn1, nbuf1 = _pick_feature_tile(hid_p, B, in_p, 2, budget)
        h = _linear_bn_relu(xp, w1p, gp, bp, tn1, nbuf1, budget)   # [B, hid_p] bf16
        tn2, nbuf2 = _pick_feature_tile(out_p, B, hid_p, 4, budget)
        y = _linear_bn(h, w2p, tn2, nbuf2, budget)                 # [B, out_p] f32
    return y[:, :out_dim]


def projection_mlp(x, w1, gamma, beta, w2, **kw):
    return projection_mlp_forward(
        x, prepare_projection_params(w1, gamma, beta, w2), **kw)


def reference(x, w1, gamma, beta, w2):
    # Pure-JAX reference emulating the kernel's bf16-operand / f32-accum
    # numerics (same math as the PyTorch module in training mode).
    xb = x.astype(jnp.bfloat16)
    w1b = w1.astype(jnp.bfloat16)
    w2b = w2.astype(jnp.bfloat16)
    h = jnp.dot(xb, w1b, preferred_element_type=jnp.float32)
    m1 = h.mean(0, keepdims=True)
    v1 = ((h - m1) ** 2).mean(0, keepdims=True)
    h = (h - m1) * jax.lax.rsqrt(v1 + EPS) * gamma.reshape(1, -1) + beta.reshape(1, -1)
    h = jnp.maximum(h, 0.0).astype(jnp.bfloat16)
    y = jnp.dot(h, w2b, preferred_element_type=jnp.float32)
    m2 = y.mean(0, keepdims=True)
    v2 = ((y - m2) ** 2).mean(0, keepdims=True)
    return (y - m2) * jax.lax.rsqrt(v2 + EPS)


def _init_linear(key, fan_in, fan_out):
    bound = 1.0 / (fan_in ** 0.5)
    return jax.random.uniform(key, (fan_in, fan_out), jnp.float32,
                              minval=-bound, maxval=bound)


if __name__ == "__main__":
    key = jax.random.PRNGKey(0)
    kx, kw1, kw2, kx2, kw3, kw4 = jax.random.split(key, 6)

    # Primary demo: lane-dense shapes (exercises the fused single-call path).
    B, in_dim, hidden_dim, out_dim = 16, 128, 256, 128
    x = jax.random.normal(kx, (B, in_dim), jnp.float32)
    w1 = _init_linear(kw1, in_dim, hidden_dim)
    w2 = _init_linear(kw2, hidden_dim, out_dim)
    gamma = jnp.ones((hidden_dim,), jnp.float32)
    beta = jnp.zeros((hidden_dim,), jnp.float32)

    params = prepare_projection_params(w1, gamma, beta, w2)   # one-time weight prep
    ref = reference(x, w1, gamma, beta, w2)

    out = jax.block_until_ready(projection_mlp_forward(x, params))
    assert out.shape == (B, out_dim)
    assert jnp.allclose(out, ref, atol=2e-2, rtol=2e-2), "mismatch (fused)"

    # Same problem through the tiled two-stage path (resident x/h, collapsed K,
    # parallel feature axis) to exercise it as well.
    out_t = jax.block_until_ready(projection_mlp_forward(x, params, force_tiled=True))
    assert jnp.allclose(out_t, ref, atol=2e-2, rtol=2e-2), "mismatch (tiled)"

    # Secondary demo: non-multiple-of-128 dims exercise the padding path.
    B2, in2, hid2, out2 = 8, 48, 72, 24
    x2 = jax.random.normal(kx2, (B2, in2), jnp.float32)
    w1b = _init_linear(kw3, in2, hid2)
    w2b = _init_linear(kw4, hid2, out2)
    g2 = jnp.ones((hid2,), jnp.float32)
    b2 = jnp.zeros((hid2,), jnp.float32)

    out2_arr = jax.block_until_ready(projection_mlp(x2, w1b, g2, b2, w2b))
    ref2 = reference(x2, w1b, g2, b2, w2b)
    assert out2_arr.shape == (B2, out2)
    assert jnp.allclose(out2_arr, ref2, atol=2e-2, rtol=2e-2), "mismatch (padded)"

    print("KERNEL_OK")
</pallas_src>

<mosaic_0001>
module attributes {stable_mosaic.version = 11 : i64} {
  func.func @_fused_kernel(%arg0: i32, %arg1: memref<16x128xbf16, #tpu.memory_space<vmem>>, %arg2: memref<128x256xbf16, #tpu.memory_space<vmem>>, %arg3: memref<1x256xf32, #tpu.memory_space<vmem>>, %arg4: memref<1x256xf32, #tpu.memory_space<vmem>>, %arg5: memref<256x128xbf16, #tpu.memory_space<vmem>>, %arg6: memref<16x128xf32, #tpu.memory_space<vmem>>, %arg7: memref<16x256xbf16, #tpu.memory_space<vmem>>) attributes {dimension_semantics = [#tpu.dimension_semantics<arbitrary>], iteration_bounds = array<i64: 1>, scalar_prefetch = 0 : i64, scratch_operands = 1 : i64, tpu.core_type = #tpu.core_type<tc>, window_params = [{pipeline_mode = #tpu.pipeline_mode<synchronous>, transform_indices = @transform_0, window_bounds = array<i64: 16, 128>}, {pipeline_mode = #tpu.pipeline_mode<synchronous>, transform_indices = @transform_1, window_bounds = array<i64: 128, 256>}, {pipeline_mode = #tpu.pipeline_mode<synchronous>, transform_indices = @transform_2, window_bounds = array<i64: 1, 256>}, {pipeline_mode = #tpu.pipeline_mode<synchronous>, transform_indices = @transform_3, window_bounds = array<i64: 1, 256>}, {pipeline_mode = #tpu.pipeline_mode<synchronous>, transform_indices = @transform_4, window_bounds = array<i64: 256, 128>}, {pipeline_mode = #tpu.pipeline_mode<synchronous>, transform_indices = @transform_5, window_bounds = array<i64: 16, 128>}]} {
    %c0 = arith.constant 0 : index
    %c0_0 = arith.constant 0 : index
    %0 = vector.load %arg1[%c0, %c0_0] : memref<16x128xbf16, #tpu.memory_space<vmem>>, vector<16x128xbf16>
    %c0_1 = arith.constant 0 : index
    %c0_2 = arith.constant 0 : index
    %1 = vector.load %arg2[%c0_1, %c0_2] : memref<128x256xbf16, #tpu.memory_space<vmem>>, vector<128x256xbf16>
    %cst = arith.constant dense<0.000000e+00> : vector<16x256xf32>
    %2 = tpu.matmul %0, %1, %cst {dimension_numbers = #tpu.dot_dimension_numbers<[1], [0], [0], [1], [0, 0, 1, 1], [], []>} : vector<16x128xbf16>, vector<128x256xbf16>, vector<16x256xf32> -> vector<16x256xf32>
    %cst_3 = arith.constant dense<0.000000e+00> : vector<256xf32>
    %3 = vector.multi_reduction <add>, %2, %cst_3 [0] : vector<16x256xf32> to vector<256xf32>
    %4 = vector.shape_cast %3 : vector<256xf32> to vector<1x256xf32>
    %cst_4 = arith.constant 1.600000e+01 : f32
    %5 = vector.broadcast %cst_4 : f32 to vector<1x256xf32>
    %6 = arith.divf %4, %5 : vector<1x256xf32>
    %7 = vector.broadcast %6 : vector<1x256xf32> to vector<16x256xf32>
    %8 = arith.subf %2, %7 : vector<16x256xf32>
    %9 = arith.mulf %8, %8 : vector<16x256xf32>
    %cst_5 = arith.constant dense<0.000000e+00> : vector<256xf32>
    %10 = vector.multi_reduction <add>, %9, %cst_5 [0] : vector<16x256xf32> to vector<256xf32>
    %11 = vector.shape_cast %10 : vector<256xf32> to vector<1x256xf32>
    %cst_6 = arith.constant 1.600000e+01 : f32
    %12 = vector.broadcast %cst_6 : f32 to vector<1x256xf32>
    %13 = arith.divf %11, %12 : vector<1x256xf32>
    %cst_7 = arith.constant 9.99999974E-6 : f32
    %14 = vector.broadcast %cst_7 : f32 to vector<1x256xf32>
    %15 = arith.addf %13, %14 : vector<1x256xf32>
    %16 = math.rsqrt %15 : vector<1x256xf32>
    %17 = vector.broadcast %16 : vector<1x256xf32> to vector<16x256xf32>
    %18 = arith.mulf %8, %17 : vector<16x256xf32>
    %c0_8 = arith.constant 0 : index
    %c0_9 = arith.constant 0 : index
    %19 = vector.load %arg3[%c0_8, %c0_9] : memref<1x256xf32, #tpu.memory_space<vmem>>, vector<1x256xf32>
    %20 = vector.broadcast %19 : vector<1x256xf32> to vector<16x256xf32>
    %21 = arith.mulf %18, %20 : vector<16x256xf32>
    %c0_10 = arith.constant 0 : index
    %c0_11 = arith.constant 0 : index
    %22 = vector.load %arg4[%c0_10, %c0_11] : memref<1x256xf32, #tpu.memory_space<vmem>>, vector<1x256xf32>
    %23 = vector.broadcast %22 : vector<1x256xf32> to vector<16x256xf32>
    %24 = arith.addf %21, %23 : vector<16x256xf32>
    %cst_12 = arith.constant 0.000000e+00 : f32
    %25 = vector.broadcast %cst_12 : f32 to vector<16x256xf32>
    %26 = arith.maximumf %24, %25 : vector<16x256xf32>
    %27 = arith.truncf %26 : vector<16x256xf32> to vector<16x256xbf16>
    %c0_13 = arith.constant 0 : index
    %c0_14 = arith.constant 0 : index
    %28 = vector.load %arg7[%c0_13, %c0_14] : memref<16x256xbf16, #tpu.memory_space<vmem>>, vector<16x256xbf16>
    tpu.vector_store %arg7[%c0_13, %c0_14], %27 {strides = array<i32>} : memref<16x256xbf16, #tpu.memory_space<vmem>>, vector<16x256xbf16>,
    %c0_15 = arith.constant 0 : index
    %c0_16 = arith.constant 0 : index
    %29 = vector.load %arg7[%c0_15, %c0_16] : memref<16x256xbf16, #tpu.memory_space<vmem>>, vector<16x256xbf16>
    %c0_17 = arith.constant 0 : index
    %c0_18 = arith.constant 0 : index
    %30 = vector.load %arg5[%c0_17, %c0_18] : memref<256x128xbf16, #tpu.memory_space<vmem>>, vector<256x128xbf16>
    %cst_19 = arith.constant dense<0.000000e+00> : vector<16x128xf32>
    %31 = tpu.matmul %29, %30, %cst_19 {dimension_numbers = #tpu.dot_dimension_numbers<[1], [0], [0], [1], [0, 0, 1, 1], [], []>} : vector<16x256xbf16>, vector<256x128xbf16>, vector<16x128xf32> -> vector<16x128xf32>
    %cst_20 = arith.constant dense<0.000000e+00> : vector<128xf32>
    %32 = vector.multi_reduction <add>, %31, %cst_20 [0] : vector<16x128xf32> to vector<128xf32>
    %33 = vector.shape_cast %32 : vector<128xf32> to vector<1x128xf32>
    %cst_21 = arith.constant 1.600000e+01 : f32
    %34 = vector.broadcast %cst_21 : f32 to vector<1x128xf32>
    %35 = arith.divf %33, %34 : vector<1x128xf32>
    %36 = vector.broadcast %35 : vector<1x128xf32> to vector<16x128xf32>
    %37 = arith.subf %31, %36 : vector<16x128xf32>
    %38 = arith.mulf %37, %37 : vector<16x128xf32>
    %cst_22 = arith.constant dense<0.000000e+00> : vector<128xf32>
    %39 = vector.multi_reduction <add>, %38, %cst_22 [0] : vector<16x128xf32> to vector<128xf32>
    %40 = vector.shape_cast %39 : vector<128xf32> to vector<1x128xf32>
    %cst_23 = arith.constant 1.600000e+01 : f32
    %41 = vector.broadcast %cst_23 : f32 to vector<1x128xf32>
    %42 = arith.divf %40, %41 : vector<1x128xf32>
    %cst_24 = arith.constant 9.99999974E-6 : f32
    %43 = vector.broadcast %cst_24 : f32 to vector<1x128xf32>
    %44 = arith.addf %42, %43 : vector<1x128xf32>
    %45 = math.rsqrt %44 : vector<1x128xf32>
    %46 = vector.broadcast %45 : vector<1x128xf32> to vector<16x128xf32>
    %47 = arith.mulf %37, %46 : vector<16x128xf32>
    %c0_25 = arith.constant 0 : index
    %c0_26 = arith.constant 0 : index
    %48 = vector.load %arg6[%c0_25, %c0_26] : memref<16x128xf32, #tpu.memory_space<vmem>>, vector<16x128xf32>
    tpu.vector_store %arg6[%c0_25, %c0_26], %47 {strides = array<i32>} : memref<16x128xf32, #tpu.memory_space<vmem>>, vector<16x128xf32>,
    return
  }
  func.func @transform_0(%arg0: i32) -> (i32, i32) {
    %c0_i32 = arith.constant 0 : i32
    %c0_i32_0 = arith.constant 0 : i32
    %c0_i32_1 = arith.constant 0 : i32
    return %c0_i32, %c0_i32_0 : i32, i32
  }
  func.func @transform_1(%arg0: i32) -> (i32, i32) {
    %c0_i32 = arith.constant 0 : i32
    %c0_i32_0 = arith.constant 0 : i32
    %c0_i32_1 = arith.constant 0 : i32
    return %c0_i32, %c0_i32_0 : i32, i32
  }
  func.func @transform_2(%arg0: i32) -> (i32, i32) {
    %c0_i32 = arith.constant 0 : i32
    %c0_i32_0 = arith.constant 0 : i32
    %c0_i32_1 = arith.constant 0 : i32
    return %c0_i32, %c0_i32_0 : i32, i32
  }
  func.func @transform_3(%arg0: i32) -> (i32, i32) {
    %c0_i32 = arith.constant 0 : i32
    %c0_i32_0 = arith.constant 0 : i32
    %c0_i32_1 = arith.constant 0 : i32
    return %c0_i32, %c0_i32_0 : i32, i32
  }
  func.func @transform_4(%arg0: i32) -> (i32, i32) {
    %c0_i32 = arith.constant 0 : i32
    %c0_i32_0 = arith.constant 0 : i32
    %c0_i32_1 = arith.constant 0 : i32
    return %c0_i32, %c0_i32_0 : i32, i32
  }
  func.func @transform_5(%arg0: i32) -> (i32, i32) {
    %c0_i32 = arith.constant 0 : i32
    %c0_i32_0 = arith.constant 0 : i32
    %c0_i32_1 = arith.constant 0 : i32
    return %c0_i32, %c0_i32_0 : i32, i32
  }
}

</mosaic_0001>

<bundles_post_ra>
// kernel: tpu_custom_call.1
= control target key start
LH: loop header
LB: loop body
LE: loop exit
PB: predicated region body
PF: predicated region fallthrough
CT: control target
= control target key end

     0   :  { %10 = vsyncpa [#allocation4], 0  ;;  %s818_s0 = inlined_call_operand.hbm [shape: bf16[16,128], index: 0, kind: input, shape index: {}]   ;;  %s819_s1 = inlined_call_operand.hbm [shape: bf16[128,256], index: 1, kind: input, shape index: {}]   ;;  %s820_s2 = inlined_call_operand.vmem [shape: f32[1,256], index: 2, kind: input, shape index: {}]   ;;  %s821_s3 = inlined_call_operand.vmem [shape: f32[1,256], index: 3, kind: input, shape index: {}]   ;;  %s822_s4 = inlined_call_operand.hbm [shape: bf16[256,128], index: 4, kind: input, shape index: {}]   ;;  %s823_s5 = inlined_call_operand.hbm [shape: f32[16,128], index: 5, kind: output, shape index: {}]  }
   0x1   :  { %11 = vsyncpa [#allocation7], 0 }
   0x2   :  { %12 = vsyncpa [#allocation5], 0  ;;  %s719_s18 = smov [#allocation6]   ;;  %s625_s22 = scalar_lea.hbm %s819_s1, 2048 }
   0x3   :  { %s30_s19 = sshll.u32 %s719_s18, 4  ;;  %p626_p0 = scmp.ne.s32.totalorder %s819_s1, %s625_s22  ;;  %s31_s19 = int_to_ptr.vmem [resolvable:$true] %s30_s19 }
   0x4   :  { %p629_p1 = scmp.lt.u32.totalorder %s625_s22, %s819_s1 }
   0x6   :  { %p631_p2 = pnand %p629_p1, %p626_p0 }
   0x8   :  { %634 = shalt.err (!%p631_p2)
}
   0x9   :  { %s635_s27 = scalar_lea.vmem %s31_s19, 2048  ;;  %p640_p4 = scmp.lt.s32.totalorder %s31_s19, %s31_s19 }
   0xa   :  { %p636_p3 = scmp.ne.s32.totalorder %s31_s19, %s635_s27  ;;  %p641_p5 = scmp.lt.s32.totalorder %s635_s27, %s635_s27 }
   0xc   :  { %p642_p6 = por %p641_p5, %p640_p4 }
   0xe   :  { %p643_p7 = pnand %p642_p6, %p636_p3 }
  0x10   :  { %646 = shalt.err (!%p643_p7)
}
  0x11   :  { %s720_s28 = smov 128   ;;  %s721_s29 = smov 8  }
  0x12   :  { %36 = dma.hbm_to_vmem [thread:$0]  %s819_s1, 2048, %s31_s19, [#allocation7], %s720_s28, %s720_s28, %s721_s29  }
  0x13   :  { %s722_s7 = smov [#allocation3]   ;;  %s647_s11 = scalar_lea.hbm %s818_s0, 128 }
  0x14   :  { %s18_s8 = sshll.u32 %s722_s7, 4  ;;  %p648_p8 = scmp.ne.s32.totalorder %s818_s0, %s647_s11  ;;  %s19_s8 = int_to_ptr.vmem [resolvable:$true] %s18_s8 }
  0x15   :  { %p651_p9 = scmp.lt.u32.totalorder %s647_s11, %s818_s0 }
  0x17   :  { %p653_p10 = pnand %p651_p9, %p648_p8 }
  0x19   :  { %656 = shalt.err (!%p653_p10)
}
  0x1a   :  { %s657_s16 = scalar_lea.vmem %s19_s8, 128  ;;  %p662_p12 = scmp.lt.s32.totalorder %s19_s8, %s19_s8 }
  0x1b   :  { %p658_p11 = scmp.ne.s32.totalorder %s19_s8, %s657_s16  ;;  %p663_p13 = scmp.lt.s32.totalorder %s657_s16, %s657_s16 }
  0x1d   :  { %p664_p0 = por %p663_p13, %p662_p12 }
  0x1f   :  { %p665_p1 = pnand %p664_p0, %p658_p11 }
  0x21   :  { %668 = shalt.err (!%p665_p1)
}
  0x22   :  { %s723_s1 = smov 64   ;;  %s724_s17 = smov 4  }
  0x23   :  { %24 = dma.hbm_to_vmem [thread:$0]  %s818_s0, 128, %s19_s8, [#allocation4], %s723_s1, %s723_s1, %s724_s17  }
  0x24   :  { %s725_s20 = smov [#allocation8]   ;;  %s669_s24 = scalar_lea.hbm %s822_s4, 2048 }
  0x25   :  { %s46_s21 = sshll.u32 %s725_s20, 4  ;;  %p670_p2 = scmp.ne.s32.totalorder %s822_s4, %s669_s24  ;;  %s47_s21 = int_to_ptr.vmem [resolvable:$true] %s46_s21 }
  0x26   :  { %p673_p3 = scmp.lt.u32.totalorder %s669_s24, %s822_s4 }
  0x28   :  { %p675_p4 = pnand %p673_p3, %p670_p2 }
  0x2a   :  { %678 = shalt.err (!%p675_p4)
}
  0x2b   :  { %s679_s6 = scalar_lea.vmem %s47_s21, 2048  ;;  %p684_p6 = scmp.lt.s32.totalorder %s47_s21, %s47_s21 }
  0x2c   :  { %p680_p5 = scmp.ne.s32.totalorder %s47_s21, %s679_s6  ;;  %p685_p7 = scmp.lt.s32.totalorder %s679_s6, %s679_s6 }
  0x2e   :  { %p686_p8 = por %p685_p7, %p684_p6 }
  0x30   :  { %p687_p9 = pnand %p686_p8, %p680_p5 }
  0x32   :  { %690 = shalt.err (!%p687_p9)
}
  0x33   :  { %52 = dma.hbm_to_vmem [thread:$0]  %s822_s4, 2048, %s47_s21, [#allocation7], %s723_s1, %s723_s1, %s724_s17  }
  0x34   :  { %713 = dma.done.wait [#allocation4], 128  }
  0x35   :  { %714 = vsyncadd [#allocation4], 4294967168 }
  0x36   :  { %715 = dma.done.wait [#allocation7], 4096  }
  0x37   :  { %716 = vsyncadd [#allocation7], 4294963200  ;;  %v726_v0 = vmov 0   ;;  %v578_v1 = vld [vmem:[#allocation6 + $0x4] ss:$8 sps:$4 sm:$0xff]   ;;  %v602_v17 = vld [vmem:[#allocation3] sm:$0xff]  }
  0x38   :  { %199 = vmatprep.mubr.bf16.mxu0 %v726_v0  ;;  %v580_v2 = vld [vmem:[#allocation6] ss:$8 sps:$4 sm:$0xff]   ;;  %167 = vmatprep.subr.bf16.mxu0 %v578_v1  ;;  %v581_v3 = vld [vmem:[#allocation6 + $0x14] ss:$8 sps:$4 sm:$0xff]   ;;  %v583_v4 = vld [vmem:[#allocation6 + $0x10] ss:$8 sps:$4 sm:$0xff]  }
  0x39   :  { %168 = vmatpush1.bf16.msra.mxu0 %v580_v2  ;;  %v584_v5 = vld [vmem:[#allocation6 + $0x24] ss:$8 sps:$4 sm:$0xff]   ;;  %v586_v6 = vld [vmem:[#allocation6 + $0x20] ss:$8 sps:$4 sm:$0xff]   ;;  %v587_v7 = vld [vmem:[#allocation6 + $0x34] ss:$8 sps:$4 sm:$0xff]  }
  0x3a   :  { %169 = vmatprep.subr.bf16.mxu0 %v581_v3  ;;  %v589_v8 = vld [vmem:[#allocation6 + $0x30] ss:$8 sps:$4 sm:$0xff]   ;;  %v590_v9 = vld [vmem:[#allocation6 + $0x44] ss:$8 sps:$4 sm:$0xff]   ;;  %v592_v10 = vld [vmem:[#allocation6 + $0x40] ss:$8 sps:$4 sm:$0xff]  }
  0x3b   :  { %v593_v11 = vld [vmem:[#allocation6 + $0x54] ss:$8 sps:$4 sm:$0xff]   ;;  %v595_v12 = vld [vmem:[#allocation6 + $0x50] ss:$8 sps:$4 sm:$0xff]   ;;  %v596_v13 = vld [vmem:[#allocation6 + $0x64] ss:$8 sps:$4 sm:$0xff]  }
  0x3c   :  { %v598_v14 = vld [vmem:[#allocation6 + $0x60] ss:$8 sps:$4 sm:$0xff]   ;;  %v599_v15 = vld [vmem:[#allocation6 + $0x74] ss:$8 sps:$4 sm:$0xff]   ;;  %v601_v16 = vld [vmem:[#allocation6 + $0x70] ss:$8 sps:$4 sm:$0xff]  }
  0x3d   :  { %170 = vmatpush1.bf16.msra.mxu0 %v583_v4  ;;  %v603_v18 = vld [vmem:[#allocation8 + $0x40] sm:$0xff]   ;;  %v605_v20 = vld [vmem:[#allocation8 + $0x48] sm:$0xff]   ;;  %v607_v22 = vld [vmem:[#allocation8 + $0x50] sm:$0xff]  }
  0x3e   :  { %171 = vmatprep.subr.bf16.mxu0 %v584_v5  ;;  %v604_v19 = vld [vmem:[#allocation8] sm:$0xff]   ;;  %547 = vmatprep.subr.bf16.mxu1 %v603_v18  ;;  %v606_v21 = vld [vmem:[#allocation8 + $0x8] sm:$0xff]   ;;  %v608_v23 = vld [vmem:[#allocation8 + $0x10] sm:$0xff]  }
  0x3f   :  { %548 = vmatpush3.bf16.msra.mxu1 %v604_v19  ;;  %v609_v24 = vld [vmem:[#allocation8 + $0x58] sm:$0xff]   ;;  %v611_v26 = vld [vmem:[#allocation8 + $0x60] sm:$0xff]   ;;  %v613_v28 = vld [vmem:[#allocation8 + $0x68] sm:$0xff]  }
  0x40   :  { %549 = vmatprep.subr.bf16.mxu1 %v605_v20  ;;  %v610_v25 = vld [vmem:[#allocation8 + $0x18] sm:$0xff]   ;;  %v612_v27 = vld [vmem:[#allocation8 + $0x20] sm:$0xff]   ;;  %v614_v29 = vld [vmem:[#allocation8 + $0x28] sm:$0xff]  }
  0x41   :  { %172 = vmatpush1.bf16.msra.mxu0 %v586_v6  ;;  %v615_v30 = vld [vmem:[#allocation8 + $0x70] sm:$0xff]   ;;  %v617_v32 = vld [vmem:[#allocation8 + $0x78] sm:$0xff]  }
  0x42   :  { %173 = vmatprep.subr.bf16.mxu0 %v587_v7  ;;  %v616_v31 = vld [vmem:[#allocation8 + $0x30] sm:$0xff]   ;;  %v618_v33 = vld [vmem:[#allocation8 + $0x38] sm:$0xff]  }
  0x43   :  { %550 = vmatpush3.bf16.msra.mxu1 %v606_v21  ;;  %v259_v19 = vld [vmem:[%s820_s2] sm:$0x3]  ;;  %s727_s2 = smov [#allocation9]  }
  0x44   :  { %551 = vmatprep.subr.bf16.mxu1 %v607_v22  ;;  %v275_v21 = vld [vmem:[%s821_s3] sm:$0x3]  ;;  %s501_s3 = sshll.u32 %s727_s2, 4  ;;  %s502_s3 = int_to_ptr.vmem [resolvable:$true] %s501_s3 }
  0x45   :  { %174 = vmatpush1.bf16.msra.mxu0 %v589_v8  ;;  %s691_s11 = scalar_lea.vmem %s502_s3, 256  ;;  %p696_p11 = scmp.lt.s32.totalorder %s502_s3, %s502_s3 }
  0x46   :  { %175 = vmatprep.subr.bf16.mxu0 %v590_v9  ;;  %p692_p10 = scmp.ne.s32.totalorder %s502_s3, %s691_s11  ;;  %p697_p12 = scmp.lt.s32.totalorder %s691_s11, %s691_s11 }
  0x47   :  { %552 = vmatpush3.bf16.msra.mxu1 %v608_v23 }
  0x48   :  { %553 = vmatprep.subr.bf16.mxu1 %v609_v24  ;;  %p698_p13 = por %p697_p12, %p696_p11 }
  0x49   :  { %176 = vmatpush1.bf16.msra.mxu0 %v592_v10 }
  0x4a   :  { %177 = vmatprep.subr.bf16.mxu0 %v593_v11  ;;  %p699_p0 = pnand %p698_p13, %p692_p10 }
  0x4b   :  { %554 = vmatpush3.bf16.msra.mxu1 %v610_v25 }
  0x4c   :  { %555 = vmatprep.subr.bf16.mxu1 %v611_v26 }
  0x4d   :  { %178 = vmatpush1.bf16.msra.mxu0 %v595_v12 }
  0x4e   :  { %179 = vmatprep.subr.bf16.mxu0 %v596_v13  ;;  %v261_v13 = vlaneseq }
  0x4f   :  { %556 = vmatpush3.bf16.msra.mxu1 %v612_v27 }
  0x50   :  { %557 = vmatprep.subr.bf16.mxu1 %v613_v28 }
  0x51   :  { %180 = vmatpush1.bf16.msra.mxu0 %v598_v14 }
  0x52   :  { %181 = vmatprep.subr.bf16.mxu0 %v599_v15 }
  0x53   :  { %558 = vmatpush3.bf16.msra.mxu1 %v614_v29 }
  0x54   :  { %559 = vmatprep.subr.bf16.mxu1 %v615_v30 }
  0x55   :  { %182 = vmatpush1.bf16.msra.mxu0 %v601_v16 }
  0x57   :  { %560 = vmatpush3.bf16.msra.mxu1 %v616_v31 }
  0x58   :  { %200 = vmatmul.mubr.bf16.vlgmr.msra.gmra.mrb[0].mxu0 %v602_v17  ;;  %561 = vmatprep.subr.bf16.mxu1 %v617_v32  ;;  %v262_v17 = vshrl.u32 %v261_v13, 7 }
  0x5a   :  { %v263_v18 = vsub.s32 0, %v262_v17  ;;  %v267_v20 = vsub.s32 1, %v262_v17 }
  0x5b   :  { %562 = vmatpush3.bf16.msra.mxu1 %v618_v33 }
  0x5c   :  { %v264_v22 = vrot.slane %v259_v19, %v263_v18  ;;  %v268_v24 = vrot.slane %v259_v19, %v267_v20  ;;  %v280_v28 = vrot.slane %v275_v21, %v263_v18  ;;  %v284_v31 = vrot.slane %v275_v21, %v267_v20 }
 0x12b   :  { %v201_v34 = vpop.f32.mrb[0].mxu0 }
 0x12c   :  { %v203_v35 = vpop.f32.mrb[1].mxu0 }
 0x12d   :  { %v205_v36 = vpop.f32.mrb[2].mxu0 }
 0x12e   :  { %v210_v37 = vadd.f32 %v205_v36, %v201_v34  ;;  %v207_v38 = vpop.f32.mrb[3].mxu0 }
 0x12f   :  { %v217_v39 = vadd.f32 %v207_v38, %v203_v35 }
 0x130   :  { %v211_v40 = vrot.slane %v210_v37, 4 }
 0x131   :  { %v218_v41 = vrot.slane %v217_v39, 4 }
 0x132   :  { %v212_v42 = vadd.f32 %v211_v40, %v210_v37 }
 0x133   :  { %v219_v43 = vadd.f32 %v218_v41, %v217_v39 }
 0x134   :  { %v213_v44 = vrot.slane %v212_v42, 2 }
 0x135   :  { %v220_v45 = vrot.slane %v219_v43, 2 }
 0x136   :  { %v214_v46 = vadd.f32 %v213_v44, %v212_v42 }
 0x137   :  { %v221_v47 = vadd.f32 %v220_v45, %v219_v43 }
 0x138   :  { %v215_v48 = vrot.slane %v214_v46, 1 }
 0x139   :  { %v222_v49 = vrot.slane %v221_v47, 1 }
 0x13a   :  { %v216_v50 = vadd.f32 %v215_v48, %v214_v46 }
 0x13b   :  { %v223_v51 = vadd.f32 %v222_v49, %v221_v47 }
 0x13c   :  { %v225_v52 = vmul.f32 0.0625, %v216_v50 }
 0x13d   :  { %v226_v53 = vmul.f32 0.0625, %v223_v51 }
 0x13e   :  { %v227_v54 = vsub.f32 %v201_v34, %v225_v52  ;;  %v229_v55 = vsub.f32 %v205_v36, %v225_v52 }
 0x13f   :  { %v228_v56 = vsub.f32 %v203_v35, %v226_v53  ;;  %v230_v57 = vsub.f32 %v207_v38, %v226_v53 }
 0x140   :  { %v231_v58 = vmul.f32 %v227_v54, %v227_v54  ;;  %v233_v59 = vmul.f32 %v229_v55, %v229_v55 }
 0x141   :  { %v232_v60 = vmul.f32 %v228_v56, %v228_v56  ;;  %v234_v61 = vmul.f32 %v230_v57, %v230_v57 }
 0x142   :  { %v235_v62 = vadd.f32 %v233_v59, %v231_v58 }
 0x143   :  { %v242_v63 = vadd.f32 %v234_v61, %v232_v60 }
 0x144   :  { %v236_v0 = vrot.slane %v235_v62, 4 }
 0x145   :  { %v243_v1 = vrot.slane %v242_v63, 4 }
 0x146   :  { %v237_v2 = vadd.f32 %v236_v0, %v235_v62 }
 0x147   :  { %v244_v3 = vadd.f32 %v243_v1, %v242_v63 }
 0x148   :  { %v238_v4 = vrot.slane %v237_v2, 2 }
 0x149   :  { %v245_v5 = vrot.slane %v244_v3, 2 }
 0x14a   :  { %v239_v6 = vadd.f32 %v238_v4, %v237_v2 }
 0x14b   :  { %v246_v7 = vadd.f32 %v245_v5, %v244_v3 }
 0x14c   :  { %v240_v8 = vrot.slane %v239_v6, 1 }
 0x14d   :  { %v247_v9 = vrot.slane %v246_v7, 1 }
 0x14e   :  { %v241_v10 = vadd.f32 %v240_v8, %v239_v6 }
 0x14f   :  { %v248_v11 = vadd.f32 %v247_v9, %v246_v7 }
 0x150   :  { %v249_v12 = vmul.f32 0.0625, %v241_v10 }
 0x151   :  { %v250_v14 = vmul.f32 0.0625, %v248_v11 }
 0x152   :  { %v251_v15 = vadd.f32 1e-05, %v249_v12 }
 0x153   :  { %v252_v16 = vadd.f32 1e-05, %v250_v14 }
 0x154   :  { %619 = vrsqrt.f32 %v251_v15 }
 0x155   :  { %621 = vrsqrt.f32 %v252_v16 }
 0x15e   :  { %v620_v23 = vpop.eup %619 }
 0x15f   :  { %v622_v25 = vpop.eup %621  ;;  %v255_v26 = vmul.f32 %v620_v23, %v227_v54  ;;  %v257_v27 = vmul.f32 %v620_v23, %v229_v55 }
 0x160   :  { %v258_v29 = vmul.f32 %v622_v25, %v230_v57  ;;  %v256_v30 = vmul.f32 %v622_v25, %v228_v56 }
 0x161   :  { %v273_v32 = vmul.f32 %v264_v22, %v257_v27  ;;  %v271_v33 = vmul.f32 %v264_v22, %v255_v26 }
 0x162   :  { %v272_v34 = vmul.f32 %v268_v24, %v256_v30  ;;  %v274_v35 = vmul.f32 %v268_v24, %v258_v29 }
 0x163   :  { %v287_v36 = vadd.f32 %v280_v28, %v271_v33  ;;  %v289_v37 = vadd.f32 %v280_v28, %v273_v32 }
 0x164   :  { %v288_v38 = vadd.f32 %v284_v31, %v272_v34  ;;  %v290_v39 = vadd.f32 %v284_v31, %v274_v35 }
 0x165   :  { %v291_v40 = vmax.f32 %v287_v36, 0.0  ;;  %v293_v41 = vmax.f32 %v289_v37, 0.0 }
 0x166   :  { %v292_v42 = vmax.f32 %v288_v38, 0.0  ;;  %v294_v43 = vmax.f32 %v290_v39, 0.0 }
 0x167   :  { %v295_v44 = vpack.c.bf16 %v293_v41, %v291_v40 }
 0x168   :  { %v296_v45 = vpack.c.bf16 %v294_v43, %v292_v42 }
 0x16a   :  { %461 = vmatprep.mubr.bf16.mxu1 %v296_v45 }
 0x16b   :  { %462 = vmatmul.mubr.bf16.vlgmr.msra.gmra.mrb[0].mxu1 %v295_v44 }
 0x23e   :  { %v563_v46 = vpop.f32.mrb[0].mxu1 }
 0x23f   :  { %v564_v47 = vpop.f32.mrb[1].mxu1 }
 0x240   :  { %v565_v48 = vadd.f32 %v564_v47, %v563_v46  ;;  %v566_v49 = vpop.f32.mrb[2].mxu1 }
 0x241   :  { %v567_v50 = vpop.f32.mrb[3].mxu1 }
 0x242   :  { %v568_v51 = vadd.f32 %v567_v50, %v566_v49 }
 0x244   :  { %v470_v52 = vadd.f32 %v568_v51, %v565_v48 }
 0x246   :  { %v471_v53 = vrot.slane %v470_v52, 4 }
 0x248   :  { %v472_v54 = vadd.f32 %v471_v53, %v470_v52 }
 0x24a   :  { %v473_v55 = vrot.slane %v472_v54, 2 }
 0x24c   :  { %v474_v56 = vadd.f32 %v473_v55, %v472_v54 }
 0x24e   :  { %v475_v57 = vrot.slane %v474_v56, 1 }
 0x250   :  { %v476_v58 = vadd.f32 %v475_v57, %v474_v56 }
 0x252   :  { %v477_v59 = vmul.f32 0.0625, %v476_v58 }
 0x254   :  { %v478_v60 = vsub.f32 %v565_v48, %v477_v59  ;;  %v479_v61 = vsub.f32 %v568_v51, %v477_v59 }
 0x256   :  { %v480_v62 = vmul.f32 %v478_v60, %v478_v60  ;;  %v481_v63 = vmul.f32 %v479_v61, %v479_v61 }
 0x258   :  { %v482_v0 = vadd.f32 %v481_v63, %v480_v62 }
 0x25a   :  { %v483_v1 = vrot.slane %v482_v0, 4 }
 0x25c   :  { %v484_v2 = vadd.f32 %v483_v1, %v482_v0 }
 0x25e   :  { %v485_v3 = vrot.slane %v484_v2, 2 }
 0x260   :  { %v486_v4 = vadd.f32 %v485_v3, %v484_v2 }
 0x262   :  { %v487_v5 = vrot.slane %v486_v4, 1 }
 0x264   :  { %v488_v6 = vadd.f32 %v487_v5, %v486_v4 }
 0x266   :  { %v489_v7 = vmul.f32 0.0625, %v488_v6 }
 0x268   :  { %v490_v8 = vadd.f32 1e-05, %v489_v7 }
 0x26a   :  { %623 = vrsqrt.f32 %v490_v8 }
 0x274   :  { %v624_v9 = vpop.eup %623 }
 0x275   :  { %v493_v10 = vmul.f32 %v624_v9, %v479_v61  ;;  %v492_v11 = vmul.f32 %v624_v9, %v478_v60 }
 0x277   :  { %495 = vst [vmem:[#allocation9 + $0x8] sm:$0xff] %v493_v10  ;;  %494 = vst [vmem:[#allocation9] sm:$0xff] %v492_v11 }
 0x278   :  { %702 = shalt.err (!%p699_p0)
}
 0x279   :  { %s703_s14 = scalar_lea.hbm %s823_s5, 256 }
 0x27a   :  { %p704_p1 = scmp.ne.s32.totalorder %s823_s5, %s703_s14  ;;  %p707_p2 = scmp.lt.u32.totalorder %s703_s14, %s823_s5 }
 0x27c   :  { %p709_p3 = pnand %p707_p2, %p704_p1 }
 0x27e   :  { %712 = shalt.err (!%p709_p3)
}
 0x27f   :  { %507 = dma.vmem_to_hbm [thread:$0]  %s502_s3, 256, %s823_s5, [#allocation5], %s720_s28, %s720_s28, %s721_s29  }
 0x280   :  { %717 = dma.done.wait [#allocation5], 256  }
 0x281   :  { %718 = vsyncadd [#allocation5], 4294967040 }
 0x282   :  { %511 = vsyncpa [#allocation4], 1 }
 0x283   :  { %512 = vsyncpa [#allocation7], 1 }
 0x284   :  { %513 = vsyncpa [#allocation5], 1 }

</bundles_post_ra>
